<compile_context>
chip_gen: v7x
topology: tpu7x:2x2x1
jax: 0.10.0
libtpu: 0.0.40
codegen_flags: <defaults>
</compile_context>

<pallas_src>
import jax
import jax.numpy as jnp
from jax.experimental import pallas as pl
from jax.experimental.pallas import tpu as pltpu


def _round_up(x, m):
    return ((x + m - 1) // m) * m


# Widen int8 A^T to bf16 in chunks of this many src rows per MXU dot so the
# bf16 temp stays small (chunk * tm * 2 B) and its stores stay hidden under the
# A^T DMA even on v5e (single vst slot).
_WIDEN_CHUNK = 2048


def _hw_budget():
    """Per-generation tile maxima, scoped-VMEM limit and TensorCore count.

    The int8 A^T tile is the big operand: 8192x1024 int8 = 8 MiB, double
    buffered 16 MiB, plus a <=4 MiB chunked widen temp.
    """
    try:
        vmem_cap = getattr(pltpu.get_tpu_info(), "vmem_capacity_bytes",
                           64 * 1024 * 1024)
    except Exception:  # unknown backend: conservative (v7x-sized) budget
        vmem_cap = 64 * 1024 * 1024
    if vmem_cap <= 64 * 1024 * 1024:
        # v7x-class: 64 MiB VMEM per TensorCore, 2 TensorCores per chip.
        return 1024, 8192, 40 * 1024 * 1024, 2
    # v5e / v6e: 128 MiB VMEM, single TensorCore.
    return 1024, 8192, 64 * 1024 * 1024, 1


def _select_tiles(n_dst, n_src, tile_m, tile_k):
    tm_max, tk_max, vmem_limit, n_cores = _hw_budget()
    if tile_m is None:
        # Guarantee the "parallel" dst axis has >= n_cores tiles so both v7x
        # TensorCores get work even for small/medium dst counts.
        tile_m = min(tm_max, _round_up(-(-n_dst // n_cores), 128))
    if tile_k is None:
        tile_k = min(tk_max, _round_up(n_src, 128))
    assert tile_m % 128 == 0 and tile_k % 128 == 0, "tiles must be multiples of 128"
    return tile_m, tile_k, vmem_limit


def _sage_conv_sum_kernel(ws_ref, wn_ref, at_ref, ht_ref, hd_ref, o_ref, acc_ref):
    """One SAGEConvSUM layer (feat_drop=0, bias=False, no edge_weight), tiled.

    ws_ref, wn_ref : SMEM [F_out, F_in]      fc_self / fc_neigh weights (f32)
    at_ref         : VMEM [TK, TM]  int8     A^T tile  (A[dst, src] -> A^T[src, dst])
    ht_ref         : VMEM [Fp, TK]  bf16     h_src^T K-tile (features zero-padded to Fp)
    hd_ref         : VMEM [Fp, TM]  bf16     h_dst^T M-tile (dst = first N_dst src nodes)
    o_ref          : VMEM [F_out, TM] f32    output tile (lane-dense: nodes on lanes)
    acc_ref        : VMEM [Fp, TM]  f32      neighbor-sum accumulator
    """
    k = pl.program_id(1)

    @pl.when(k == 0)
    def _init():
        acc_ref[...] = jnp.zeros_like(acc_ref)

    # copy_u + sum aggregation (the hot matmul): h_neigh^T += h_src^T @ A^T.
    # A^T arrives as int8 (HBM-byte reduction); widen to bf16 in bounded chunks
    # immediately before the MXU dot so the widen temp / its stores stay small.
    tk = at_ref.shape[0]
    chunk = min(tk, _WIDEN_CHUNK)
    for c in range(tk // chunk):  # static unroll (<= 4 iterations)
        c0 = c * chunk
        a_chunk = at_ref[c0:c0 + chunk, :].astype(jnp.bfloat16)
        acc_ref[...] += jnp.dot(ht_ref[:, c0:c0 + chunk], a_chunk,
                                preferred_element_type=jnp.float32)

    @pl.when(k == pl.num_programs(1) - 1)
    def _finalize():
        # rst^T = Ws @ h_dst^T + Wn @ h_neigh^T.  F_in/F_out are tiny (=1 in
        # SimpleAGG), so do the projections as VPU broadcast multiply-adds with
        # scalar weights read from SMEM instead of K=1 MXU matmuls.
        h_dst = hd_ref[...].astype(jnp.float32)
        h_neigh = acc_ref[...]
        f_out, f_in = ws_ref.shape
        rows = []
        for fo in range(f_out):
            row = jnp.zeros_like(h_neigh[0:1, :])
            for fi in range(f_in):
                row = row + ws_ref[fo, fi] * h_dst[fi:fi + 1, :] \
                          + wn_ref[fo, fi] * h_neigh[fi:fi + 1, :]
            rows.append(row)
        out = rows[0] if f_out == 1 else jnp.concatenate(rows, axis=0)
        o_ref[...] = out.astype(o_ref.dtype)


def sage_conv_sum_t(a_t_i8, h_t, w_self, w_neigh, *, n_dst, n_src,
                    tile_m=None, tile_k=None):
    """One SAGEConvSUM layer in feature-major form.

    a_t_i8  : [N_src, N_dst] int8  transposed block adjacency (A^T[s, d] = 1 iff
              edge s->d), produced once at minibatch construction time.
    h_t     : [F_in, N_src]  source-node features, feature-major.
    w_self  : [F_out, F_in]  fc_self.weight
    w_neigh : [F_out, F_in]  fc_neigh.weight
    returns : [F_out, N_dst] float32

    fc_neigh commutes with the (linear, bias-free) sum aggregation, so applying
    it after message passing is exact for both lin_before_mp branches of the
    reference forward.
    """
    f_in = h_t.shape[0]
    f_out = w_self.shape[0]

    tm, tk, vmem_limit = _select_tiles(n_dst, n_src, tile_m, tile_k)
    n_dst_p = _round_up(n_dst, tm)
    n_src_p = _round_up(n_src, tk)
    f_pad = _round_up(f_in, 8)  # pad feature (sublane) dim so the MXU LHS is >= 8 rows

    # Cheap int8 zero-pad to the tile grid (1 B/elem, vs the old fused f32-read
    # bf16-write transpose+cast+pad).  TODO(synk): have the sampler emit this.
    a_t = jnp.pad(a_t_i8, ((0, n_src_p - n_src), (0, n_dst_p - n_dst)))
    # Features pre-cast to bf16 in the wrapper: halves the re-streamed ht DMA
    # and removes the per-grid-step f32->bf16 pack inside the kernel.
    ht = jnp.pad(h_t.astype(jnp.bfloat16),
                 ((0, f_pad - f_in), (0, n_src_p - n_src)))
    # DGL block convention: dst nodes are the first N_dst src nodes.
    # NOTE: silently wrong for adjacencies that do not follow that convention.
    hd = jnp.pad(h_t[:, :n_dst].astype(jnp.bfloat16),
                 ((0, f_pad - f_in), (0, n_dst_p - n_dst)))

    grid = (n_dst_p // tm, n_src_p // tk)  # (dst tiles "parallel", src reduction last)

    bytes_accessed = (
        n_src_p * n_dst_p * 1                              # A^T int8, streamed once
        + f_pad * n_src_p * 2 * (n_dst_p // tm)            # ht bf16, re-streamed per dst tile
        + f_pad * n_dst_p * 2                              # hd bf16
        + f_out * n_dst_p * 4                              # output f32
    )
    cost = pl.CostEstimate(flops=2 * f_pad * n_src_p * n_dst_p,
                           bytes_accessed=bytes_accessed,
                           transcendentals=0)

    out_t = pl.pallas_call(
        _sage_conv_sum_kernel,
        out_shape=jax.ShapeDtypeStruct((f_out, n_dst_p), jnp.float32),
        grid_spec=pltpu.PrefetchScalarGridSpec(
            num_scalar_prefetch=0,
            grid=grid,
            in_specs=[
                pl.BlockSpec(memory_space=pltpu.MemorySpace.SMEM),   # w_self (resident)
                pl.BlockSpec(memory_space=pltpu.MemorySpace.SMEM),   # w_neigh (resident)
                pl.BlockSpec((tk, tm), lambda i, k: (k, i)),         # A^T tile (int8)
                pl.BlockSpec((f_pad, tk), lambda i, k: (0, k)),      # h_src^T K-tile (bf16)
                pl.BlockSpec((f_pad, tm), lambda i, k: (0, i)),      # h_dst^T M-tile (bf16)
            ],
            out_specs=pl.BlockSpec((f_out, tm), lambda i, k: (0, i)),
            scratch_shapes=[pltpu.VMEM((f_pad, tm), jnp.float32)],
        ),
        compiler_params=pltpu.CompilerParams(
            dimension_semantics=("parallel", "arbitrary"),
            vmem_limit_bytes=vmem_limit,
        ),
        cost_estimate=cost,
    )(w_self.astype(jnp.float32), w_neigh.astype(jnp.float32), a_t, ht, hd)

    return out_t[:, :n_dst]


def simple_agg(blocks, x, params, *, tile_m=None, tile_k=None):
    """SimpleAGG.forward: stacked SAGEConvSUM layers (nn.Dropout(0) == identity).

    blocks : list of [N_dst, N_src] 0/1 block adjacencies (any integer/float dtype).
    x      : [N_src0, F_in] node features.
    params : list of (fc_self.weight, fc_neigh.weight), each [F_out, F_in].
    """
    # One-time minibatch construction: adjacency transposed + quantized to int8.
    # (In production the sampler emits A^T int8 directly — see TODO at top.)
    a_t_list = [jnp.asarray(adj).astype(jnp.int8).T for adj in blocks]
    shapes = [adj.shape for adj in blocks]  # (n_dst, n_src) per block

    h_t = x.T  # go feature-major once; stay lane-dense between layers
    for a_t_i8, (n_dst, n_src), (w_self, w_neigh) in zip(a_t_list, shapes, params):
        h_t = sage_conv_sum_t(a_t_i8, h_t, w_self, w_neigh,
                              n_dst=n_dst, n_src=n_src,
                              tile_m=tile_m, tile_k=tile_k)
    return h_t.T  # back to node-major [N_dst_last, F_out]


if __name__ == "__main__":
    key = jax.random.PRNGKey(0)
    num_hop = 2
    in_feats = 1
    n_classes = 1
    # src node counts per hop; dst nodes of each block are the first n_dst src nodes
    n_nodes = [320, 256, 192]

    keys = jax.random.split(key, 2 * num_hop + 1)
    x = jax.random.normal(keys[0], (n_nodes[0], in_feats), dtype=jnp.float32)

    blocks = []
    params = []
    for i in range(num_hop):
        n_src, n_dst = n_nodes[i], n_nodes[i + 1]
        # Sampler-style int8 0/1 block adjacency.
        adj = jax.random.bernoulli(
            keys[1 + 2 * i], p=0.05, shape=(n_dst, n_src)
        ).astype(jnp.int8)
        # fc_neigh.weight is reset to ones (reset_parameters override);
        # fc_self.weight keeps nn.Linear's default uniform(-1/sqrt(in), 1/sqrt(in)) init.
        w_neigh = jnp.ones((n_classes, in_feats), dtype=jnp.float32)
        bound = 1.0 / (in_feats ** 0.5)
        w_self = jax.random.uniform(
            keys[2 + 2 * i], (n_classes, in_feats),
            minval=-bound, maxval=bound, dtype=jnp.float32,
        )
        blocks.append(adj)
        params.append((w_self, w_neigh))

    # Small tile override so the demo exercises a multi-step (parallel x reduction)
    # grid with accumulator init/finalize; production uses the per-generation defaults.
    out = simple_agg(blocks, x, params, tile_m=128, tile_k=128)
    out = jax.block_until_ready(out)
    assert out.shape == (n_nodes[-1], n_classes)

    # pure-f32 JAX reference of the same semantics (kernel runs A^T int8->bf16 and
    # features in bf16 on the MXU with f32 accumulation -> bf16-level tolerance)
    h_ref = x
    for adj, (w_self, w_neigh) in zip(blocks, params):
        neigh = adj.astype(jnp.float32) @ h_ref
        h_ref = h_ref[: adj.shape[0]] @ w_self.T + neigh @ w_neigh.T

    err = float(jnp.max(jnp.abs(out - h_ref)))
    scale = float(jnp.max(jnp.abs(h_ref))) + 1.0
    assert err <= 5e-2 * scale, f"Pallas output mismatch: max|err|={err}, scale={scale}"

    print("KERNEL_OK")
</pallas_src>

<mosaic_0001>
module attributes {stable_mosaic.version = 11 : i64} {
  func.func @_sage_conv_sum_kernel(%arg0: i32, %arg1: i32, %arg2: memref<1x1xf32, #tpu.memory_space<smem>>, %arg3: memref<1x1xf32, #tpu.memory_space<smem>>, %arg4: memref<128x128xi8, #tpu.memory_space<vmem>>, %arg5: memref<8x128xbf16, #tpu.memory_space<vmem>>, %arg6: memref<8x128xbf16, #tpu.memory_space<vmem>>, %arg7: memref<1x128xf32, #tpu.memory_space<vmem>>, %arg8: memref<8x128xf32, #tpu.memory_space<vmem>>) attributes {dimension_semantics = [#tpu.dimension_semantics<parallel>, #tpu.dimension_semantics<arbitrary>], iteration_bounds = array<i64: 2, 3>, scalar_prefetch = 0 : i64, scratch_operands = 1 : i64, tpu.core_type = #tpu.core_type<tc>, window_params = [{transform_indices = @transform_0, window_bounds = array<i64: 1, 1>}, {transform_indices = @transform_1, window_bounds = array<i64: 1, 1>}, {transform_indices = @transform_2, window_bounds = array<i64: 128, 128>}, {transform_indices = @transform_3, window_bounds = array<i64: 8, 128>}, {transform_indices = @transform_4, window_bounds = array<i64: 8, 128>}, {transform_indices = @transform_5, window_bounds = array<i64: 1, 128>}]} {
    %c0_i32 = arith.constant 0 : i32
    %0 = arith.cmpi eq, %arg1, %c0_i32 : i32
    %1 = arith.extui %0 : i1 to i32
    %c0_i32_0 = arith.constant 0 : i32
    %2 = arith.cmpi ne, %1, %c0_i32_0 : i32
    scf.if %2 {
      %cst_9 = arith.constant 0.000000e+00 : f32
      %13 = vector.broadcast %cst_9 : f32 to vector<8x128xf32>
      %c0_10 = arith.constant 0 : index
      %c0_11 = arith.constant 0 : index
      %14 = vector.load %arg8[%c0_10, %c0_11] : memref<8x128xf32, #tpu.memory_space<vmem>>, vector<8x128xf32>
      tpu.vector_store %arg8[%c0_10, %c0_11], %13 {strides = array<i32>} : memref<8x128xf32, #tpu.memory_space<vmem>>, vector<8x128xf32>,
    } else {
    }
    %c0 = arith.constant 0 : index
    %c0_1 = arith.constant 0 : index
    %3 = vector.load %arg4[%c0, %c0_1] : memref<128x128xi8, #tpu.memory_space<vmem>>, vector<128x128xi8>
    %4 = arith.sitofp %3 : vector<128x128xi8> to vector<128x128xbf16>
    %c0_2 = arith.constant 0 : index
    %c0_3 = arith.constant 0 : index
    %5 = vector.load %arg8[%c0_2, %c0_3] : memref<8x128xf32, #tpu.memory_space<vmem>>, vector<8x128xf32>
    %c0_4 = arith.constant 0 : index
    %c0_5 = arith.constant 0 : index
    %6 = vector.load %arg5[%c0_4, %c0_5] : memref<8x128xbf16, #tpu.memory_space<vmem>>, vector<8x128xbf16>
    %cst = arith.constant dense<0.000000e+00> : vector<8x128xf32>
    %7 = tpu.matmul %6, %4, %cst {dimension_numbers = #tpu.dot_dimension_numbers<[1], [0], [0], [1], [0, 0, 1, 1], [], []>} : vector<8x128xbf16>, vector<128x128xbf16>, vector<8x128xf32> -> vector<8x128xf32>
    %8 = arith.addf %5, %7 : vector<8x128xf32>
    %c0_6 = arith.constant 0 : index
    %c0_7 = arith.constant 0 : index
    %9 = vector.load %arg8[%c0_6, %c0_7] : memref<8x128xf32, #tpu.memory_space<vmem>>, vector<8x128xf32>
    tpu.vector_store %arg8[%c0_6, %c0_7], %8 {strides = array<i32>} : memref<8x128xf32, #tpu.memory_space<vmem>>, vector<8x128xf32>,
    %c2_i32 = arith.constant 2 : i32
    %10 = arith.cmpi eq, %arg1, %c2_i32 : i32
    %11 = arith.extui %10 : i1 to i32
    %c0_i32_8 = arith.constant 0 : i32
    %12 = arith.cmpi ne, %11, %c0_i32_8 : i32
    scf.if %12 {
      %c0_9 = arith.constant 0 : index
      %c0_10 = arith.constant 0 : index
      %13 = vector.load %arg6[%c0_9, %c0_10] : memref<8x128xbf16, #tpu.memory_space<vmem>>, vector<8x128xbf16>
      %14 = arith.extf %13 : vector<8x128xbf16> to vector<8x128xf32>
      %c0_11 = arith.constant 0 : index
      %c0_12 = arith.constant 0 : index
      %15 = vector.load %arg8[%c0_11, %c0_12] : memref<8x128xf32, #tpu.memory_space<vmem>>, vector<8x128xf32>
      %cst_13 = arith.constant 0.000000e+00 : f32
      %16 = vector.broadcast %cst_13 : f32 to vector<1x128xf32>
      %c0_14 = arith.constant 0 : index
      %c0_15 = arith.constant 0 : index
      %17 = memref.load %arg2[%c0_14, %c0_15] : memref<1x1xf32, #tpu.memory_space<smem>>
      %18 = vector.extract_strided_slice %14 {offsets = [0, 0], sizes = [1, 128], strides = [1, 1]} : vector<8x128xf32> to vector<1x128xf32>
      %19 = vector.broadcast %17 : f32 to vector<1x128xf32>
      %20 = arith.mulf %19, %18 : vector<1x128xf32>
      %21 = arith.addf %16, %20 : vector<1x128xf32>
      %c0_16 = arith.constant 0 : index
      %c0_17 = arith.constant 0 : index
      %22 = memref.load %arg3[%c0_16, %c0_17] : memref<1x1xf32, #tpu.memory_space<smem>>
      %23 = vector.extract_strided_slice %15 {offsets = [0, 0], sizes = [1, 128], strides = [1, 1]} : vector<8x128xf32> to vector<1x128xf32>
      %24 = vector.broadcast %22 : f32 to vector<1x128xf32>
      %25 = arith.mulf %24, %23 : vector<1x128xf32>
      %26 = arith.addf %21, %25 : vector<1x128xf32>
      %c0_18 = arith.constant 0 : index
      %c0_19 = arith.constant 0 : index
      %27 = vector.load %arg7[%c0_18, %c0_19] : memref<1x128xf32, #tpu.memory_space<vmem>>, vector<1x128xf32>
      tpu.vector_store %arg7[%c0_18, %c0_19], %26 {strides = array<i32>} : memref<1x128xf32, #tpu.memory_space<vmem>>, vector<1x128xf32>,
    } else {
    }
    return
  }
  func.func @transform_0(%arg0: i32, %arg1: i32) -> (i32, i32) {
    %c0_i32 = arith.constant 0 : i32
    %c0_i32_0 = arith.constant 0 : i32
    %c0_i32_1 = arith.constant 0 : i32
    return %c0_i32, %c0_i32_0 : i32, i32
  }
  func.func @transform_1(%arg0: i32, %arg1: i32) -> (i32, i32) {
    %c0_i32 = arith.constant 0 : i32
    %c0_i32_0 = arith.constant 0 : i32
    %c0_i32_1 = arith.constant 0 : i32
    return %c0_i32, %c0_i32_0 : i32, i32
  }
  func.func @transform_2(%arg0: i32, %arg1: i32) -> (i32, i32) {
    %c0_i32 = arith.constant 0 : i32
    return %arg1, %arg0 : i32, i32
  }
  func.func @transform_3(%arg0: i32, %arg1: i32) -> (i32, i32) {
    %c0_i32 = arith.constant 0 : i32
    %c0_i32_0 = arith.constant 0 : i32
    return %c0_i32, %arg1 : i32, i32
  }
  func.func @transform_4(%arg0: i32, %arg1: i32) -> (i32, i32) {
    %c0_i32 = arith.constant 0 : i32
    %c0_i32_0 = arith.constant 0 : i32
    return %c0_i32, %arg0 : i32, i32
  }
  func.func @transform_5(%arg0: i32, %arg1: i32) -> (i32, i32) {
    %c0_i32 = arith.constant 0 : i32
    %c0_i32_0 = arith.constant 0 : i32
    return %c0_i32, %arg0 : i32, i32
  }
}

</mosaic_0001>

<bundles_post_ra>
// kernel: tpu_custom_call.1
= control target key start
LH: loop header
LB: loop body
LE: loop exit
PB: predicated region body
PF: predicated region fallthrough
CT: control target
= control target key end

     0   :  { %s1335_s0 = inlined_call_operand.<no memory space> [shape: f32[1,1], index: 0, kind: input, shape index: {}]   ;;  %s1336_s1 = inlined_call_operand.<no memory space> [shape: f32[1,1], index: 1, kind: input, shape index: {}]   ;;  %s1337_s2 = inlined_call_operand.hbm [shape: s8[384,256], index: 2, kind: input, shape index: {}]   ;;  %s1338_s3 = inlined_call_operand.hbm [shape: bf16[8,384], index: 3, kind: input, shape index: {}]   ;;  %s1339_s4 = inlined_call_operand.vmem [shape: bf16[8,256], index: 4, kind: input, shape index: {}]   ;;  %s1340_s5 = inlined_call_operand.hbm [shape: f32[1,256], index: 5, kind: output, shape index: {}]  }
   0x1   :  { %1351 = sst [smem:[#allocation19_spill]] %s1337_s2 }
   0x2   :  { %10 = sst [smem:[#allocation3]] %s1335_s0 }
   0x3   :  { %11 = sst [smem:[#allocation4]] %s1336_s1 }
   0x4   :  { %12 = vsyncpa [#allocation6], 0 }
   0x5   :  { %14 = vsyncpa [#allocation6 + $0x1], 0 }
   0x6   :  { %15 = vsyncpa [#allocation9], 0 }
   0x7   :  { %17 = vsyncpa [#allocation9 + $0x1], 0 }
   0x8   :  { %18 = vsyncpa [#allocation7], 0 }
   0x9   :  { %20 = vsyncpa [#allocation7 + $0x1], 0  ;;  %s963_s22 = smov 0   ;;  %s965_s23 = smov 0  }
   0xa   :  { %s967_s24 = smov 0   ;;  %s969_s25 = smov 0  }
   0xb   :  { %s971_s26 = smov 0   ;;  %s973_s0 = smov 0  }
   0xc   :  { %s975_s27 = smov 0   ;;  %s977_s1 = smov 0  }
   0xd   :  { %s979_s28 = smov 0   ;;  %s981_s29 = smov 0  }
   0xe   :  { %s983_s30 = smov 0   ;;  %s985_s6 = smov 0  }
   0xf   :  { %s987_s7 = smov 0   ;;  %s989_s8 = smov 0  }
  0x10 LB: > { %1352 = sst [smem:[#allocation14_spill]] %s908_s6  ;;  %s1341_s9 = sadd.s32 1, %s908_s6  ;;  %s916_s8 = sphi %s989_s8, %s26_s8   ;;  %s912_s7 = sphi %s987_s7, %s1383_s7   ;;  %s908_s6 = sphi %s985_s6, %s1382_s6   ;;  %s904_s30 = sphi %s983_s30, %s1381_s30   ;;  %s900_s29 = sphi %s981_s29, %s1380_s29   ;;  %s896_s28 = sphi %s979_s28, %s1392_s28   ;;  %s892_s1 = sphi %s977_s1, %s1391_s1   ;;  %s888_s27 = sphi %s975_s27, %s1390_s27   ;;  %s884_s0 = sphi %s973_s0, %s1389_s0   ;;  %s880_s26 = sphi %s971_s26, %s1388_s26   ;;  %s876_s25 = sphi %s969_s25, %s1387_s25   ;;  %s872_s24 = sphi %s967_s24, %s1386_s24   ;;  %s868_s23 = sphi %s965_s23, %s1385_s23   ;;  %s864_s22 = sphi %s963_s22, %s1384_s22  }
  0x11   : > { %1353 = sst [smem:[#allocation15_spill]] %s912_s7  ;;  %s38_s10 = sadd.s32 1, %s912_s7 }
  0x12   : > { %p1037_p0 = scmp.ge.s32.totalorder %s1341_s9, 3  ;;  %p96_p1 = scmp.ne.s32.totalorder %s896_s28, %s892_s1 }
  0x13   : > { %p1343_p2 = scmp.eq.s32.totalorder %s916_s8, 0  ;;  %p1342_p5 = scmp.lt.s32.totalorder %s916_s8, 6 }
  0x14   : > { %s1394_s10 = smov (!%p1037_p0, %s38_s10), %s912_s7  ;;  %s210_s13 = sand.u32 1, %s896_s28  }
  0x15   : > { %p98_p3 = por %p1343_p2, %p96_p1  ;;  %s539_s14 = sshll.u32 %s908_s6, 3 }
  0x16   : > { %s524_s15 = sshll.u32 %s210_s13, 5  ;;  %s220_s16 = sadd.s32 %s912_s7, %s539_s14 }
  0x17   : > { %s527_s17 = sshll.u32 %s220_s16, 7  ;;  %s214_s18 = scalar_lea.vmem [#allocation5], %s524_s15 }
  0x18   : > { %s223_s19 = sshll.u32 %s214_s18, 4  ;;  %s1355_s2 = sld [smem:[#allocation19_spill]]  ;;  %s1062_s19 = int_to_ptr.vmem [resolvable:$true] %s223_s19 }
  0x19   : > { %p1066_p6 = pnand %p1342_p5, %p98_p3  ;;  %s1071_s14 = scalar_lea.sflag [#allocation6], %s210_s13 }
  0x1b   : > { %p708_p9 = pneg %p1066_p6 }
  0x1e   : > { %s1060_s12 = scalar_lea.hbm %s1355_s2, %s527_s17  ;;  %s711_s18 = scalar_lea.hbm %s1355_s2, 3072 }
  0x1f   : > { %s706_s15 = scalar_lea.hbm %s1060_s12, 512  ;;  %p712_p12 = scmp.lt.u32.totalorder %s1060_s12, %s1355_s2 }
  0x20   : > { %p707_p8 = scmp.ne.s32.totalorder %s1060_s12, %s706_s15  ;;  %p713_p13 = scmp.lt.u32.totalorder %s711_s18, %s706_s15 }
  0x21   : > { %p715_p3 = scmp.lt.u32.totalorder %s706_s15, %s1060_s12 }
  0x22   : > { %p709_p10 = pnand %p708_p9, %p707_p8  ;;  %p714_p1 = por %p713_p13, %p712_p12 }
  0x24   : > { %p710_p11 = pneg %p709_p10  ;;  %p716_p5 = por %p715_p3, %p714_p1 }
  0x26   : > { %p717_p2 = pnand %p716_p5, %p710_p11 }
  0x28   : > { %720 = shalt.err (!%p717_p2)
}
  0x29   : > { %s721_s13 = scalar_lea.vmem %s1062_s19, 512  ;;  %s918_s16 = smov [#allocation5]  }
  0x2a   : > { %p722_p8 = scmp.ne.s32.totalorder %s1062_s19, %s721_s13  ;;  %s726_s17 = sshll.u32 %s918_s16, 4  ;;  %s727_s17 = int_to_ptr.vmem [resolvable:$false] %s726_s17 }
  0x2b   : > { %s728_s20 = scalar_lea.vmem %s727_s17, 1024  ;;  %p729_p7 = scmp.lt.s32.totalorder %s1062_s19, %s727_s17 }
  0x2c   : > { %p724_p10 = pnand %p722_p8, %p708_p9  ;;  %p730_p12 = scmp.lt.s32.totalorder %s728_s20, %s721_s13 }
  0x2e   : > { %p725_p4 = pneg %p724_p10  ;;  %p731_p13 = por %p730_p12, %p729_p7 }
  0x30   : > { %p732_p1 = pnand %p731_p13, %p725_p4 }
  0x32   : > { %735 = shalt.err (!%p732_p1)
}
  0x33   : > { %s919_s15 = smov 256   ;;  %s920_s18 = smov 128  }
  0x34   : > { %s921_s21 = smov 8   ;;  %p256_p2 = scmp.lt.s32.totalorder %s916_s8, 7 }
  0x35   : > { %578 = dma.hbm_to_vmem [thread:$0]  (!%p1066_p6), %s1060_s12, 512, %s1062_s19, %s1071_s14, %s919_s15, %s920_s18, %s921_s21  }
  0x36   : > { %p1357_p4 = scmp.ge.s32.totalorder %s916_s8, 1  ;;  %s520_s16 = sadd.s32 4294967295, %s916_s8  }
  0x37   : > { %s521_s17 = sadd.s32 4294967294, %s916_s8   ;;  %s1359_s20 = sadd.s32 1, %s908_s6 }
  0x38   : > { %p1102_p5 = pnand %p1357_p4, %p256_p2  ;;  %s1396_s20 = smov (%p1037_p0, %s1359_s20), 0 }
  0x39   : > { %1360 = sst [smem:[#allocation16_spill]] %s1396_s20  ;;  %p1361_p6 = scmp.ge.s32.totalorder %s1394_s10, 2 }
  0x3a   : > { %s84_s9 = ssub.s32 %s908_s6, %s1396_s20  ;;  %p102_p7 = scmp.ne.s32.totalorder %s892_s1, %s888_s27 }
  0x3b   : > { %s1398_s10 = smov (%p1361_p6, %s1394_s10), 0  ;;  %p1125_p9 = scmp.eq.s32.totalorder %s520_s16, 0 }
  0x3c   : > { %1362 = sst [smem:[#allocation17_spill]] %s1398_s10  ;;  %s85_s12 = ssub.s32 %s912_s7, %s1398_s10 }
  0x3d   : > { %s86_s11 = sor.u32 %s85_s12, %s84_s9  ;;  %p113_p0 = scmp.eq.s32.totalorder %s84_s9, 0 }
  0x3e   : > { %p87_p11 = scmp.eq.s32.totalorder %s86_s11, 0  ;;  %p1131_p3 = por %p1125_p9, %p102_p7 }
  0x3f   : > { %s115_s27 = sadd.s32 1, %s884_s0  ;;  %p122_p8 = scmp.ne.s32.totalorder %s884_s0, %s880_s26 }
  0x40   : > { %s1364_s14 = scalar_select %p1131_p3, 1, 0 }
  0x41   : > { %s1365_s15 = sadd.s32 1, %s896_s28  ;;  %p1367_p10 = scmp.eq.s32.totalorder %s916_s8, 0 }
  0x42   : > { %s1141_s18 = scalar_select %p87_p11, %s896_s28, %s1365_s15  }
  0x43   : > { %s1144_s21 = scalar_select %p113_p0, %s884_s0, %s115_s27  }
  0x44   : > { %1366 = sst [smem:[#allocation18_spill]] %s1141_s18  ;;  %p1148_p12 = por %p122_p8, %p1367_p10 }
  0x45   : > { %p128_p13 = scmp.ne.s32.totalorder %s880_s26, %s876_s25  ;;  %p165_p1 = scmp.eq.s32.totalorder %s85_s12, 0 }
  0x46   : > { %s167_s9 = sadd.s32 1, %s872_s24  ;;  %p177_p4 = scmp.ne.s32.totalorder %s872_s24, %s868_s23 }
  0x47   : > { %p1157_p2 = por %p128_p13, %p1125_p9  ;;  %p178_p6 = scmp.eq.s32.totalorder %s520_s16, 5 }
  0x48   : > { %s1164_s15 = scalar_select %p165_p1, %s872_s24, %s167_s9  }
  0x49   : > { %s1369_s11 = scalar_select %p1157_p2, 1, 0 }
  0x4a   : > { %p183_p7 = scmp.ne.s32.totalorder %s868_s23, %s864_s22  ;;  %p184_p0 = scmp.eq.s32.totalorder %s521_s17, 5 }
  0x4b   : > { %s233_s27 = sand.u32 1, %s884_s0   ;;  %p1169_p11 = por %p178_p6, %p177_p4 }
  0x4c   : > { %p1173_p8 = por %p184_p0, %p183_p7  ;;  %s528_s12 = sshll.u32 %s233_s27, 2 }
  0x4d   : > { %s1370_s10 = scalar_select %p1169_p11, 1, 0 }
  0x4e   : > { %s1371_s25 = scalar_select %p1173_p8, 1, 0 }
  0x4f   : > { %s529_s19 = sshll.u32 %s908_s6, 6  ;;  %s237_s16 = scalar_lea.vmem [#allocation8], %s528_s12 }
  0x50   : > { %s1181_s18 = scalar_lea.hbm %s1338_s3, %s529_s19  ;;  %s244_s17 = sshll.u32 %s237_s16, 4  ;;  %s1183_s17 = int_to_ptr.vmem [resolvable:$true] %s244_s17 }
  0x51   : > { %p1372_p9 = scmp.lt.s32.totalorder %s916_s8, 6  ;;  %s234_s6 = scalar_lea.sflag [#allocation9], %s233_s27 }
  0x52   : > { %s736_s7 = scalar_lea.hbm %s1181_s18, 64  ;;  %s741_s2 = scalar_lea.hbm %s1338_s3, 192 }
  0x53   : > { %p1189_p10 = pnand %p1372_p9, %p1148_p12  ;;  %p737_p13 = scmp.ne.s32.totalorder %s1181_s18, %s736_s7 }
  0x54   : > { %p742_p12 = scmp.lt.u32.totalorder %s1181_s18, %s1338_s3  ;;  %p743_p7 = scmp.lt.u32.totalorder %s741_s2, %s736_s7 }
  0x55   : > { %p738_p1 = pneg %p1189_p10  ;;  %p745_p9 = scmp.lt.u32.totalorder %s736_s7, %s1181_s18 }
  0x56   : > { %p744_p0 = por %p743_p7, %p742_p12 }
  0x57   : > { %p739_p4 = pnand %p738_p1, %p737_p13 }
  0x58   : > { %p746_p8 = por %p745_p9, %p744_p0 }
  0x59   : > { %p740_p6 = pneg %p739_p4 }
  0x5b   : > { %p747_p11 = pnand %p746_p8, %p740_p6 }
  0x5d   : > { %750 = shalt.err (!%p747_p11)
}
  0x5e   : > { %s751_s27 = scalar_lea.vmem %s1183_s17, 64  ;;  %s922_s20 = smov [#allocation8]  }
  0x5f   : > { %p752_p13 = scmp.ne.s32.totalorder %s1183_s17, %s751_s27  ;;  %s756_s12 = sshll.u32 %s922_s20, 4  ;;  %s757_s12 = int_to_ptr.vmem [resolvable:$false] %s756_s12 }
  0x60   : > { %s758_s19 = scalar_lea.vmem %s757_s12, 128  ;;  %p759_p3 = scmp.lt.s32.totalorder %s1183_s17, %s757_s12 }
  0x61   : > { %p754_p4 = pnand %p752_p13, %p738_p1  ;;  %p760_p12 = scmp.lt.s32.totalorder %s758_s19, %s751_s27 }
  0x63   : > { %p755_p2 = pneg %p754_p4  ;;  %p761_p7 = por %p760_p12, %p759_p3 }
  0x65   : > { %p762_p0 = pnand %p761_p7, %p755_p2 }
  0x67   : > { %765 = shalt.err (!%p762_p0)
}
  0x68   : > { %581 = dma.hbm_to_vmem [thread:$0]  (!%p1189_p10), %s1181_s18, 64, %s1183_s17, %s234_s6  }
  0x69   : > { %260 = sbr.rel (%p1102_p5) target bundleno = 413 (0x19d), region = 40  ;;  %s262_s7 = sand.u32 (!%p1102_p5), 1, %s892_s1  }
  0x6a   : > { %s531_s2 = sshll.u32 (!%p1102_p5), %s262_s7, 5  ;;  %s263_s16 = scalar_lea.sflag (!%p1102_p5), [#allocation6], %s262_s7 }
  0x6b   : > { %s1221_s20 = scalar_lea.vmem (!%p1102_p5), [#allocation5], %s531_s2  ;;  %p1374_p11 = scmp.ne.s32.totalorder (!%p1102_p5), %s1364_s14, 0 }
  0x70   : > { %851 = dma.done.wait (%p1374_p11), %s263_s16, 512  }
  0x71   : > { %853 = vsyncadd (%p1374_p11), %s263_s16, 4294966784  ;;  %s271_s9 = sand.u32 1, %s880_s26   ;;  %p1375_p5 = scmp.ne.s32.totalorder %s1369_s11, 0 }
  0x72   : > { %s1228_s27 = sshll.u32 %s271_s9, 2  ;;  %s272_s6 = scalar_lea.sflag [#allocation9], %s271_s9 }
  0x73   : > { %s275_s13 = scalar_lea.vmem [#allocation8], %s1228_s27 }
  0x74   : > { %855 = dma.done.wait (%p1375_p5), %s272_s6, 64  }
  0x75   : > { %857 = vsyncadd (%p1375_p5), %s272_s6, 4294967232  ;;  %s308_s18 = sand.u32 1, %s868_s23   ;;  %p311_p3 = scmp.lt.s32.totalorder %s904_s30, 1 }
  0x76   : > { %s1245_s2 = scalar_lea.vmem [#allocation10], %s308_s18  ;;  %p534_p2 = scmp.ne.s32.totalorder %s900_s29, 0 }
  0x77   : > { %s312_s14 = scalar_select %p311_p3, %s904_s30, 1 }
  0x78   : > { %319 = sbr.rel (%p534_p2) target bundleno = 127 (0x7f), region = 52  ;;  %v923_v0 = vmov (!%p534_p2), 0.0  }
  0x79   : > { %s533_s17 = sshll.u32 %s312_s14, 2  ;;  %320 = vst [vmem:[#allocation2] sm:$0xff] (!%p534_p2), %v923_v0 }
  0x7a   : > { %s1241_s7 = scalar_lea.vmem %s1339_s4, %s533_s17 }
  0x7f PF: > { %v321_v1 = vld [vmem:[%s1221_s20] sm:$0xff]  ;;  %v924_v2 = vmov 0.0   ;;  %vm925_vm0 = vmmov 0   ;;  %v322_v5 = vld [vmem:[%s1221_s20 + $0x8] sm:$0xff]  ;;  %v323_v8 = vld [vmem:[%s1221_s20 + $0x10] sm:$0xff]  ;;  %p535_p8 = scmp.ne.s32.totalorder %s900_s29, 2 }
  0x80   : > { %549 = vmatprep.subr.bf16.mxu0 %v924_v2  ;;  %v325_v3 = vunpack.c.l.s8.bf16 %v321_v1  ;;  %565 = vmatprep.mubr.msk.bf16.mxu0 %vm925_vm0, %v924_v2  ;;  %v326_v4 = vunpack.c.h.s8.bf16 %v321_v1  ;;  %v327_v6 = vunpack.c.l.s8.bf16 %v322_v5  ;;  %v328_v7 = vunpack.c.h.s8.bf16 %v322_v5  ;;  %v324_v11 = vld [vmem:[%s1221_s20 + $0x18] sm:$0xff]  ;;  %v334_v14 = vld [vmem:[%s275_s13] sm:$0xf]  ;;  %s384_s11 = sld [smem:[#allocation3]] (!%p535_p8) }
  0x81   : > { %v329_v9 = vunpack.c.l.s8.bf16 %v323_v8  ;;  %v330_v10 = vunpack.c.h.s8.bf16 %v323_v8  ;;  %v331_v12 = vunpack.c.l.s8.bf16 %v324_v11  ;;  %v332_v13 = vunpack.c.h.s8.bf16 %v324_v11  ;;  %v333_v15 = vld [vmem:[#allocation2] sm:$0xff]  ;;  %s388_s16 = sld [smem:[#allocation4]] (!%p535_p8) }
  0x82   : > { %550 = vmatpush3.bf16.msra.mxu0 %v325_v3  ;;  %v381_v21 = vld [vmem:[%s1241_s7] sm:$0xf] (!%p535_p8) }
  0x83   : > { %551 = vmatprep.subr.bf16.mxu0 %v924_v2  ;;  %v382_v22 = vunpack.c.l.bf16 (!%p535_p8), %v381_v21 }
  0x86   : > { %552 = vmatpush3.bf16.msra.mxu0 %v326_v4  ;;  %v385_v24 = vstv (!%p535_p8), %s384_s11 }
  0x87   : > { %553 = vmatprep.subr.bf16.mxu0 %v924_v2  ;;  %v386_v25 = vmul.f32 (!%p535_p8), %v385_v24, %v382_v22  ;;  %v389_v26 = vstv (!%p535_p8), %s388_s16 }
  0x8a   : > { %554 = vmatpush3.bf16.msra.mxu0 %v327_v6 }
  0x8b   : > { %555 = vmatprep.subr.bf16.mxu0 %v924_v2 }
  0x8e   : > { %556 = vmatpush3.bf16.msra.mxu0 %v328_v7 }
  0x8f   : > { %557 = vmatprep.subr.bf16.mxu0 %v924_v2 }
  0x92   : > { %558 = vmatpush3.bf16.msra.mxu0 %v329_v9 }
  0x93   : > { %559 = vmatprep.subr.bf16.mxu0 %v924_v2 }
  0x96   : > { %560 = vmatpush3.bf16.msra.mxu0 %v330_v10 }
  0x97   : > { %561 = vmatprep.subr.bf16.mxu0 %v924_v2 }
  0x9a   : > { %562 = vmatpush3.bf16.msra.mxu0 %v331_v12 }
  0x9b   : > { %563 = vmatprep.subr.bf16.mxu0 %v924_v2 }
  0x9e   : > { %564 = vmatpush3.bf16.msra.mxu0 %v332_v13 }
  0xa1   : > { %566 = vmatmul.mubr.bf16.vlgmr.msra.gmra.mrb[0].mxu0 %v334_v14 }
 0x171   : > { %380 = sbr.rel (%p535_p8) target bundleno = 388 (0x184), region = 56 }
 0x174   : > { %v369_v16 = vpop.f32.mrb[0].mxu0 }
 0x175   : > { %v375_v17 = vadd.f32 %v369_v16, %v333_v15  ;;  %v567_v18 = vpop.f32.mrb[1].mxu0 }
 0x176   : > { %v372_v19 = vpop.f32.mrb[2].mxu0 }
 0x177   : > { %376 = vst [vmem:[#allocation2] sm:$0xff] %v375_v17  ;;  %v568_v20 = vpop.f32.mrb[3].mxu0 }
 0x17e   : > { %v383_v23 = vld [vmem:[#allocation2] sm:$0xff] }
 0x17f   : > { %v390_v27 = vmul.f32 %v389_v26, %v383_v23 }
 0x181   : > { %v391_v28 = vadd.f32 %v390_v27, %v386_v25 }
 0x183   : > { %392 = vst [vmem:[%s1245_s2] sm:$0x1] %v391_v28 }
 0x184 PF: > { %s536_s29 = sshll.u32 %s904_s30, 4  ;;  %s406_s6 = sshll.u32 %s1245_s2, 4  ;;  %s407_s6 = int_to_ptr.vmem [resolvable:$true] %s406_s6 }
 0x185   : > { %s1261_s27 = scalar_lea.hbm %s1340_s5, %s536_s29  ;;  %s394_s13 = scalar_lea.sflag [#allocation7], %s308_s18 }
 0x186   : > { %s766_s14 = scalar_lea.vmem %s407_s6, 16  ;;  %p1376_p1 = scmp.ne.s32.totalorder %s1370_s10, 0 }
 0x187   : > { %p767_p10 = scmp.ne.s32.totalorder %s407_s6, %s766_s14  ;;  %s926_s17 = smov [#allocation10]  }
 0x188   : > { %s770_s12 = sshll.u32 %s926_s17, 4  ;;  %s771_s12 = int_to_ptr.vmem [resolvable:$false] %s770_s12 }
 0x189   : > { %p768_p6 = pnand %p767_p10, %p1376_p1  ;;  %s772_s19 = scalar_lea.vmem %s771_s12, 32 }
 0x18a   : > { %p773_p13 = scmp.lt.s32.totalorder %s407_s6, %s771_s12  ;;  %p774_p4 = scmp.lt.s32.totalorder %s772_s19, %s766_s14 }
 0x18b   : > { %p769_p9 = pneg %p768_p6 }
 0x18c   : > { %p775_p12 = por %p774_p4, %p773_p13 }
 0x18e   : > { %p776_p7 = pnand %p775_p12, %p769_p9 }
 0x190   : > { %779 = shalt.err (!%p776_p7)
}
 0x191   : > { %s780_s30 = scalar_lea.hbm %s1261_s27, 16  ;;  %s784_s2 = scalar_lea.hbm %s1340_s5, 32 }
 0x192   : > { %p781_p0 = scmp.ne.s32.totalorder %s1261_s27, %s780_s30  ;;  %p785_p3 = scmp.lt.u32.totalorder %s1261_s27, %s1340_s5 }
 0x193   : > { %p786_p2 = scmp.lt.u32.totalorder %s784_s2, %s780_s30  ;;  %p788_p10 = scmp.lt.u32.totalorder %s780_s30, %s1261_s27 }
 0x194   : > { %p782_p11 = pnand %p781_p0, %p1376_p1 }
 0x195   : > { %p787_p8 = por %p786_p2, %p785_p3 }
 0x196   : > { %p783_p5 = pneg %p782_p11 }
 0x197   : > { %p789_p6 = por %p788_p10, %p787_p8 }
 0x199   : > { %p790_p9 = pnand %p789_p6, %p783_p5 }
 0x19b   : > { %793 = shalt.err (!%p790_p9)
}
 0x19c   : > { %573 = dma.vmem_to_hbm [thread:$0]  (%p1376_p1), %s407_s6, 16, %s1261_s27, %s394_s13  }
 0x19d PF: > { %p587_p13 = scmp.ge.s32.totalorder %s916_s8, 2  ;;  %s418_s29 = sand.u32 1, %s864_s22  }
 0x19e   : > { %p1377_p4 = scmp.ne.s32.totalorder %s1371_s25, 0  ;;  %s419_s20 = scalar_lea.sflag [#allocation7], %s418_s29 }
 0x1a0   : > { %p583_p12 = pnand %p587_p13, %p1377_p4 }
 0x1a2   : > { %859 = dma.done.wait (!%p583_p12), %s419_s20, 16  }
 0x1a3   : > { %861 = vsyncadd (!%p583_p12), %s419_s20, 4294967280  ;;  %s26_s8 = sadd.s32 1, %s916_s8   ;;  %s1379_s10 = sld [smem:[#allocation18_spill]] }
 0x1a4   : > { %p1288_p7 = scmp.ge.s32.totalorder %s26_s8, 8   ;;  %s1380_s29 = sld [smem:[#allocation14_spill]] }
 0x1a5   : > { %s1381_s30 = sld [smem:[#allocation15_spill]]  ;;  %s1382_s6 = sld [smem:[#allocation16_spill]] }
 0x1a6   : > { %s1383_s7 = sld [smem:[#allocation17_spill]]  ;;  %s1384_s22 = smov %s868_s23 }
 0x1a7   : > { %s1385_s23 = smov %s872_s24  ;;  %s1386_s24 = smov %s1164_s15 }
 0x1a8   : > { %s1387_s25 = smov %s880_s26  ;;  %s1388_s26 = smov %s884_s0 }
 0x1a9   : > { %s1389_s0 = smov %s1144_s21  ;;  %s1390_s27 = smov %s892_s1 }
 0x1aa   : > { %s1391_s1 = smov %s896_s28  ;;  %s1392_s28 = smov %s1379_s10 }
 0x1ab   :  { %25 = sbr.rel (!%p1288_p7) target bundleno = 16 (0x10), region = 109 }
 0x1b2   :  { %423 = vsyncpa [#allocation6], 1 }
 0x1b3   :  { %425 = vsyncpa [#allocation6 + $0x1], 1 }
 0x1b4   :  { %426 = vsyncpa [#allocation9], 1 }
 0x1b5   :  { %428 = vsyncpa [#allocation9 + $0x1], 1 }
 0x1b6   :  { %429 = vsyncpa [#allocation7], 1 }
 0x1b7   :  { %431 = vsyncpa [#allocation7 + $0x1], 1 }

</bundles_post_ra>
